<compile_context>
chip_gen: v6e
topology: v6e:2x2x1
jax: 0.10.0
libtpu: 0.0.40
codegen_flags: <defaults>
</compile_context>

<pallas_src>
import math

import jax
import jax.numpy as jnp
from jax import lax
from jax.experimental import pallas as pl
from jax.experimental.pallas import tpu as pltpu


def _round_up(x: int, m: int) -> int:
    return ((x + m - 1) // m) * m


def _pick_vmem_limit() -> int:
    """Generation-aware scoped-VMEM limit (v7x has 64 MiB, v5e/v6e 128 MiB)."""
    try:
        info = pltpu.get_tpu_info()
        cap = getattr(info, "vmem_capacity_bytes", None)
        if cap:
            return min(int(cap) * 3 // 4, 100 * 1024 * 1024)
    except Exception:
        pass
    return 48 * 1024 * 1024  # safe on every generation incl. v7x


def _make_kernel(two_b: int, block_rows: int, block_cols: int, n_pad: int):
    mask_pad_cols = n_pad > two_b
    # Contract the last (lane) dim of BOTH operands: A @ B^T, no transpose.
    dn = (((1,), (1,)), ((), ()))

    def kernel(xr_ref, xc_ref, pos_ref, o_ref, acc_ref):
        i = pl.program_id(0)
        j = pl.program_id(1)

        @pl.when(j == 0)
        def _init():
            acc_ref[...] = jnp.zeros_like(acc_ref)

        # Operands are already normalized, temperature-scaled and cast in the
        # wrapper: one MXU matmul + one EUP exp pass per step.
        e = jnp.exp(
            lax.dot_general(xr_ref[...], xc_ref[...], dn,
                            preferred_element_type=jnp.float32))  # (TR, TC) f32

        # Drop the self-similarity diagonal (and padded columns) from the
        # computed matrix — exact regardless of matmul dtype.
        row_ids = i * block_rows + lax.broadcasted_iota(jnp.int32, e.shape, 0)
        col_ids = j * block_cols + lax.broadcasted_iota(jnp.int32, e.shape, 1)
        drop = row_ids == col_ids
        if mask_pad_cols:
            drop = drop | (col_ids >= two_b)
        e = jnp.where(drop, 0.0, e)

        acc_ref[...] += jnp.sum(e, axis=-1, keepdims=True)

        @pl.when(j == pl.num_programs(1) - 1)
        def _finalize():
            # -log(exp(pos_logit) / denom) == log(denom) - pos_logit
            o_ref[...] = jnp.log(acc_ref[...]) - pos_ref[...]

    return kernel


def contrastive_loss(out_1, out_2, tau, *, matmul_dtype=None,
                     block_rows=None, block_cols=None):
    assert out_1.shape == out_2.shape and out_1.ndim == 2
    b, d = out_1.shape
    two_b = 2 * b
    inv_tau = 1.0 / float(tau)
    scale = math.sqrt(inv_tau)  # fold temperature into the (shared) operand

    if matmul_dtype is None:
        # bf16 logit error ~ (1/tau)*2^-8; keep exact accumulation at small tau.
        matmul_dtype = jnp.float32 if tau < 0.15 else jnp.bfloat16

    # --- Hoisted preprocessing (one fused XLA pass over (B, D), in f32) ------
    x1 = out_1.astype(jnp.float32)
    x2 = out_2.astype(jnp.float32)

    def l2n(x):  # F.normalize(x, dim=-1), eps = 1e-12
        n = jnp.sqrt(jnp.sum(x * x, axis=-1, keepdims=True))
        return x / jnp.maximum(n, 1e-12)

    n1, n2 = l2n(x1), l2n(x2)
    pos_logit = jnp.sum(n1 * n2, axis=-1, keepdims=True) * inv_tau      # (B, 1)
    pos_cat = jnp.concatenate([pos_logit, pos_logit], axis=0)            # (2B, 1)
    x_cat = (jnp.concatenate([n1, n2], axis=0) * scale).astype(matmul_dtype)

    # Lane-align the contraction dim (zero padding preserves dot products).
    d_pad = _round_up(d, 128)
    if d_pad != d:
        x_cat = jnp.pad(x_cat, ((0, 0), (0, d_pad - d)))

    # --- Tile selection: 256-wide MXU outputs when the batch allows it -------
    if block_rows is None or block_cols is None:
        if two_b >= 512:
            t = 256
        elif two_b >= 256:
            t = 128                       # keep >= 2 row tiles for megacore
        else:
            t = _round_up(two_b, 8)       # tiny batch: one sublane-aligned tile
        if block_rows is None:
            block_rows = t
        if block_cols is None:
            block_cols = t
    assert block_rows % 8 == 0 and block_cols % 8 == 0

    # Pad the batch axis (instead of a full-B fallback tile); padded rows are
    # zero vectors and padded columns are masked inside the kernel.
    n_pad = _round_up(two_b, math.lcm(block_rows, block_cols))
    if n_pad != two_b:
        x_cat = jnp.pad(x_cat, ((0, n_pad - two_b), (0, 0)))
        pos_cat = jnp.pad(pos_cat, ((0, n_pad - two_b), (0, 0)))

    grid = (n_pad // block_rows, n_pad // block_cols)
    kernel = _make_kernel(two_b, block_rows, block_cols, n_pad)

    out = pl.pallas_call(
        kernel,
        out_shape=jax.ShapeDtypeStruct((n_pad, 1), jnp.float32),
        grid_spec=pltpu.PrefetchScalarGridSpec(
            num_scalar_prefetch=0,
            grid=grid,
            in_specs=[
                pl.BlockSpec((block_rows, d_pad), lambda i, j: (i, 0)),  # rows
                pl.BlockSpec((block_cols, d_pad), lambda i, j: (j, 0)),  # cols
                pl.BlockSpec((block_rows, 1), lambda i, j: (i, 0)),      # pos
            ],
            out_specs=pl.BlockSpec((block_rows, 1), lambda i, j: (i, 0)),
            scratch_shapes=[pltpu.VMEM((block_rows, 1), jnp.float32)],
        ),
        compiler_params=pltpu.CompilerParams(
            dimension_semantics=("parallel", "arbitrary"),
            vmem_limit_bytes=_pick_vmem_limit(),
        ),
    )(x_cat, x_cat, pos_cat)

    # Rows 0..B-1: view-1 losses, rows B..2B-1: view-2 losses (reference order).
    return out[:two_b, 0]


def _reference(out_1, out_2, tau):
    # Pure-JAX reference matching the PyTorch module (f32, exact matmul).
    def l2n(x):
        n = jnp.sqrt(jnp.sum(x * x, axis=-1, keepdims=True))
        return x / jnp.maximum(n, 1e-12)

    n1, n2 = l2n(out_1), l2n(out_2)
    out = jnp.concatenate([n1, n2], axis=0)
    sim = jnp.exp(jnp.dot(out, out.T, precision=jax.lax.Precision.HIGHEST) / tau)
    two_b = out.shape[0]
    mask = 1.0 - jnp.eye(two_b, dtype=sim.dtype)
    denom = jnp.sum(sim * mask, axis=-1)
    pos = jnp.exp(jnp.sum(n1 * n2, axis=-1) / tau)
    pos = jnp.concatenate([pos, pos], axis=0)
    return -jnp.log(pos / denom)


if __name__ == "__main__":
    tau = 0.5
    B, D = 8, 32

    key = jax.random.PRNGKey(0)
    k1, k2 = jax.random.split(key)
    out_1 = jax.random.normal(k1, (B, D), dtype=jnp.float32)
    out_2 = jax.random.normal(k2, (B, D), dtype=jnp.float32)

    ref = _reference(out_1, out_2, tau)

    # Default path: bf16 MXU operands (f32 accumulation) at tau = 0.5.
    loss = contrastive_loss(out_1, out_2, tau)
    jax.block_until_ready(loss)
    assert loss.shape == (2 * B,)
    assert jnp.max(jnp.abs(loss - ref)) < 2e-2, float(jnp.max(jnp.abs(loss - ref)))

    # Exact-accumulation path for a tighter structural check.
    loss_f32 = contrastive_loss(out_1, out_2, tau, matmul_dtype=jnp.float32)
    jax.block_until_ready(loss_f32)
    assert jnp.max(jnp.abs(loss_f32 - ref)) < 5e-3, float(jnp.max(jnp.abs(loss_f32 - ref)))

    print("KERNEL_OK")
</pallas_src>

<mosaic_0001>
module attributes {stable_mosaic.version = 11 : i64} {
  func.func @kernel(%arg0: i32, %arg1: i32, %arg2: memref<16x128xbf16, #tpu.memory_space<vmem>>, %arg3: memref<16x128xbf16, #tpu.memory_space<vmem>>, %arg4: memref<16x1xf32, #tpu.memory_space<vmem>>, %arg5: memref<16x1xf32, #tpu.memory_space<vmem>>, %arg6: memref<16x1xf32, #tpu.memory_space<vmem>>) attributes {dimension_semantics = [#tpu.dimension_semantics<parallel>, #tpu.dimension_semantics<arbitrary>], iteration_bounds = array<i64: 1, 1>, scalar_prefetch = 0 : i64, scratch_operands = 1 : i64, tpu.core_type = #tpu.core_type<tc>, window_params = [{transform_indices = @transform_0, window_bounds = array<i64: 16, 128>}, {transform_indices = @transform_1, window_bounds = array<i64: 16, 128>}, {transform_indices = @transform_2, window_bounds = array<i64: 16, 1>}, {transform_indices = @transform_3, window_bounds = array<i64: 16, 1>}]} {
    %c0_i32 = arith.constant 0 : i32
    %0 = arith.cmpi eq, %arg1, %c0_i32 : i32
    %1 = arith.extui %0 : i1 to i32
    %c0_i32_0 = arith.constant 0 : i32
    %2 = arith.cmpi ne, %1, %c0_i32_0 : i32
    scf.if %2 {
      %cst_13 = arith.constant 0.000000e+00 : f32
      %26 = vector.broadcast %cst_13 : f32 to vector<16x1xf32>
      %c0_14 = arith.constant 0 : index
      %c0_15 = arith.constant 0 : index
      %27 = vector.load %arg6[%c0_14, %c0_15] : memref<16x1xf32, #tpu.memory_space<vmem>>, vector<16x1xf32>
      tpu.vector_store %arg6[%c0_14, %c0_15], %26 {strides = array<i32>} : memref<16x1xf32, #tpu.memory_space<vmem>>, vector<16x1xf32>,
    } else {
    }
    %c0 = arith.constant 0 : index
    %c0_1 = arith.constant 0 : index
    %3 = vector.load %arg2[%c0, %c0_1] : memref<16x128xbf16, #tpu.memory_space<vmem>>, vector<16x128xbf16>
    %c0_2 = arith.constant 0 : index
    %c0_3 = arith.constant 0 : index
    %4 = vector.load %arg3[%c0_2, %c0_3] : memref<16x128xbf16, #tpu.memory_space<vmem>>, vector<16x128xbf16>
    %cst = arith.constant dense<0.000000e+00> : vector<16x16xf32>
    %5 = tpu.matmul %3, %4, %cst {dimension_numbers = #tpu.dot_dimension_numbers<[1], [1], [0], [0], [0, 0, 1, 0], [], []>} : vector<16x128xbf16>, vector<16x128xbf16>, vector<16x16xf32> -> vector<16x16xf32>
    %6 = math.exp %5 : vector<16x16xf32>
    %c16_i32 = arith.constant 16 : i32
    %7 = arith.muli %arg0, %c16_i32 : i32
    %8 = tpu.iota {dimensions = array<i32: 0>} : vector<16x16xi32>
    %9 = vector.broadcast %7 : i32 to vector<16x16xi32>
    %10 = arith.addi %9, %8 : vector<16x16xi32>
    %c16_i32_4 = arith.constant 16 : i32
    %11 = arith.muli %arg1, %c16_i32_4 : i32
    %12 = tpu.iota {dimensions = array<i32: 1>} : vector<16x16xi32>
    %13 = vector.broadcast %11 : i32 to vector<16x16xi32>
    %14 = arith.addi %13, %12 : vector<16x16xi32>
    %15 = arith.cmpi eq, %10, %14 : vector<16x16xi32>
    %cst_5 = arith.constant 0.000000e+00 : f32
    %16 = vector.broadcast %cst_5 : f32 to vector<16x16xf32>
    %17 = arith.select %15, %16, %6 : vector<16x16xi1>, vector<16x16xf32>
    %c0_6 = arith.constant 0 : index
    %c0_7 = arith.constant 0 : index
    %18 = vector.load %arg6[%c0_6, %c0_7] : memref<16x1xf32, #tpu.memory_space<vmem>>, vector<16x1xf32>
    %cst_8 = arith.constant dense<0.000000e+00> : vector<16xf32>
    %19 = vector.multi_reduction <add>, %17, %cst_8 [1] : vector<16x16xf32> to vector<16xf32>
    %20 = vector.shape_cast %19 : vector<16xf32> to vector<16x1xf32>
    %21 = arith.addf %18, %20 : vector<16x1xf32>
    %c0_9 = arith.constant 0 : index
    %c0_10 = arith.constant 0 : index
    %22 = vector.load %arg6[%c0_9, %c0_10] : memref<16x1xf32, #tpu.memory_space<vmem>>, vector<16x1xf32>
    tpu.vector_store %arg6[%c0_9, %c0_10], %21 {strides = array<i32>} : memref<16x1xf32, #tpu.memory_space<vmem>>, vector<16x1xf32>,
    %c0_i32_11 = arith.constant 0 : i32
    %23 = arith.cmpi eq, %arg1, %c0_i32_11 : i32
    %24 = arith.extui %23 : i1 to i32
    %c0_i32_12 = arith.constant 0 : i32
    %25 = arith.cmpi ne, %24, %c0_i32_12 : i32
    scf.if %25 {
      %c0_13 = arith.constant 0 : index
      %c0_14 = arith.constant 0 : index
      %26 = vector.load %arg6[%c0_13, %c0_14] : memref<16x1xf32, #tpu.memory_space<vmem>>, vector<16x1xf32>
      %27 = math.log %26 : vector<16x1xf32>
      %c0_15 = arith.constant 0 : index
      %c0_16 = arith.constant 0 : index
      %28 = vector.load %arg4[%c0_15, %c0_16] : memref<16x1xf32, #tpu.memory_space<vmem>>, vector<16x1xf32>
      %29 = arith.subf %27, %28 : vector<16x1xf32>
      %c0_17 = arith.constant 0 : index
      %c0_18 = arith.constant 0 : index
      %30 = vector.load %arg5[%c0_17, %c0_18] : memref<16x1xf32, #tpu.memory_space<vmem>>, vector<16x1xf32>
      tpu.vector_store %arg5[%c0_17, %c0_18], %29 {strides = array<i32>} : memref<16x1xf32, #tpu.memory_space<vmem>>, vector<16x1xf32>,
    } else {
    }
    return
  }
  func.func @transform_0(%arg0: i32, %arg1: i32) -> (i32, i32) {
    %c0_i32 = arith.constant 0 : i32
    %c0_i32_0 = arith.constant 0 : i32
    return %arg0, %c0_i32 : i32, i32
  }
  func.func @transform_1(%arg0: i32, %arg1: i32) -> (i32, i32) {
    %c0_i32 = arith.constant 0 : i32
    %c0_i32_0 = arith.constant 0 : i32
    return %arg1, %c0_i32 : i32, i32
  }
  func.func @transform_2(%arg0: i32, %arg1: i32) -> (i32, i32) {
    %c0_i32 = arith.constant 0 : i32
    %c0_i32_0 = arith.constant 0 : i32
    return %arg0, %c0_i32 : i32, i32
  }
  func.func @transform_3(%arg0: i32, %arg1: i32) -> (i32, i32) {
    %c0_i32 = arith.constant 0 : i32
    %c0_i32_0 = arith.constant 0 : i32
    return %arg0, %c0_i32 : i32, i32
  }
}

</mosaic_0001>

<bundles_post_ra>
// kernel: tpu_custom_call.1
= control target key start
LH: loop header
LB: loop body
LE: loop exit
PB: predicated region body
PF: predicated region fallthrough
CT: control target
= control target key end

     0   :  { %vm19_vm0 = vcmask 7168   ;;  %v154_v0 = vmov 0.0   ;;  %vm155_vm1 = vmmov 0   ;;  %v84_v9 = vlaneseq  ;;  %s200_s1 = inlined_call_operand.vmem [shape: bf16[16,128], index: 1, kind: input, shape index: {}]   ;;  %s201_s0 = inlined_call_operand.vmem [shape: bf16[16,128], index: 0, kind: input, shape index: {}]   ;;  %s202_s2 = inlined_call_operand.vmem [shape: f32[16,1], index: 2, kind: input, shape index: {}]   ;;  %s203_s3 = inlined_call_operand.vmem [shape: f32[16,1], index: 3, kind: output, shape index: {}]  }
   0x1   :  { %20 = vst.msk [vmem:[#allocation2] sm:$0xff] %vm19_vm0, %v154_v0  ;;  %21 = vst.msk [vmem:[#allocation2 + $0x8] sm:$0xff] %vm19_vm0, %v154_v0  ;;  %136 = vmatprep.subr.bf16.mxu0 %v154_v0  ;;  %v144_v1 = vld [vmem:[%s200_s1] sm:$0xff]   ;;  %138 = vmatprep.mubr.msk.bf16.mxu0 %vm155_vm1, %v154_v0  ;;  %vm101_vm3 = vcmask 130048   ;;  %v123_v32 = vld [vmem:[%s202_s2 + $0x8] sm:$0xff] }
   0x2   :  { %137 = vmatpush3.bf16.xpose.msra.mxu0 %v144_v1  ;;  %v145_v2 = vld [vmem:[%s201_s0] sm:$0xff]   ;;  %v85_v10 = vshrl.u32 %v84_v9, 7  ;;  %v92_v11 = vand.u32 127, %v84_v9 }
   0x3   :  { %v122_v28 = vld [vmem:[%s202_s2] sm:$0xff] }
   0x4   :  { %vm95_vm2 = vcmp.eq.s32.totalorder %v85_v10, %v92_v11  ;;  %v86_v12 = vadd.s32 8, %v85_v10 }
   0x6   :  { %vm96_vm4 = vcmp.eq.s32.totalorder %v86_v12, %v92_v11 }
   0x8   :  { %v99_v19 = vld [vmem:[#allocation2] sm:$0xff]  ;;  %v100_v22 = vld [vmem:[#allocation2 + $0x8] sm:$0xff] }
   0x9   :  { %139 = vmatmul.mubr.bf16.vlgmr.msra.gmra.mxu0 %v145_v2 }
  0xc9   :  { %v72_v3 = vpop.f32.mrf.mxu0 }
  0xca   :  { %v79_v4 = vmul.f32 1.442695, %v72_v3 }
  0xcb   :  { %v140_v5 = vpop.f32.mrf.mxu0 }
  0xcc   :  { %146 = vpow2.f32 %v79_v4 }
  0xcd   :  { %v75_v6 = vpop.f32.mrf.mxu0 }
  0xce   :  { %v81_v7 = vmul.f32 1.442695, %v75_v6 }
  0xcf   :  { %v141_v8 = vpop.f32.mrf.mxu0 }
  0xd0   :  { %148 = vpow2.f32 %v81_v7 }
  0xd9   :  { %v147_v13 = vpop.eup %146 }
  0xda   :  { %v97_v14 = vsel %vm95_vm2, 0.0, %v147_v13 }
  0xdb   :  { %v102_v15 = vsel %vm101_vm3, %v97_v14, 0.0 }
  0xdc   :  { %103 = vadd.xlane.f32.xlu0 %v102_v15 }
  0xdd   :  { %v149_v16 = vpop.eup %148 }
  0xde   :  { %v98_v17 = vsel %vm96_vm4, 0.0, %v149_v16 }
  0xdf   :  { %v105_v18 = vsel %vm101_vm3, %v98_v17, 0.0 }
  0xe0   :  { %106 = vadd.xlane.f32.xlu0 %v105_v18 }
 0x165   :  { %v104_v20 = vpop.xlane.xlu0 %103 }
 0x166   :  { %v108_v21 = vadd.f32 %v104_v20, %v99_v19 }
 0x168   :  { %111 = vst.msk [vmem:[#allocation2] sm:$0xff] %vm19_vm0, %v108_v21 }
 0x169   :  { %v107_v23 = vpop.xlane.xlu0 %106 }
 0x16a   :  { %v109_v24 = vadd.f32 %v107_v23, %v100_v22 }
 0x16c   :  { %112 = vst.msk [vmem:[#allocation2 + $0x8] sm:$0xff] %vm19_vm0, %v109_v24 }
 0x16f   :  { %v116_v25 = vld [vmem:[#allocation2] sm:$0xff] }
 0x170   :  { %150 = vlog2.f32 %v116_v25 }
 0x173   :  { %v117_v26 = vld [vmem:[#allocation2 + $0x8] sm:$0xff] }
 0x174   :  { %152 = vlog2.f32 %v117_v26 }
 0x17d   :  { %v151_v27 = vpop.eup %150 }
 0x17e   :  { %v119_v29 = vmul.f32 0.6931472, %v151_v27 }
 0x180   :  { %v124_v30 = vsub.f32 %v119_v29, %v122_v28 }
 0x181   :  { %v153_v31 = vpop.eup %152 }
 0x182   :  { %126 = vst.msk [vmem:[%s203_s3] sm:$0xff] %vm19_vm0, %v124_v30  ;;  %v121_v33 = vmul.f32 0.6931472, %v153_v31 }
 0x184   :  { %v125_v34 = vsub.f32 %v121_v33, %v123_v32 }
 0x186   :  { %127 = vst.msk [vmem:[%s203_s3 + $0x8] sm:$0xff] %vm19_vm0, %v125_v34 }

</bundles_post_ra>
